<compile_context>
chip_gen: v7x
topology: tpu7x:2x2x1
jax: 0.10.0
libtpu: 0.0.40
codegen_flags: <defaults>
</compile_context>

<pallas_src>
import jax
import jax.numpy as jnp
from jax.experimental import pallas as pl
from jax.experimental.pallas import tpu as pltpu


def _round_up(x, m):
    return (x + m - 1) // m * m


# ----------------------------------------------------------------------------
# Pallas kernels: per-sample dynamic conv (as one full-K matmul) + fused
# epilogue (filter-attn * BN scale, BN bias, optional f32 residual, ReLU).
# Grid = (B, N_tiles, M_tiles); refs are 2D (batch dim squeezed).
# ----------------------------------------------------------------------------
def _odconv_block_kernel_res(p_ref, w_ref, s_ref, b_ref, r_ref, o_ref):
    acc = jnp.dot(p_ref[...], w_ref[...], preferred_element_type=jnp.float32)
    y = acc * s_ref[...] + b_ref[...] + r_ref[...]
    o_ref[...] = jnp.maximum(y, 0.0).astype(o_ref.dtype)


def _odconv_block_kernel_nores(p_ref, w_ref, s_ref, b_ref, o_ref):
    acc = jnp.dot(p_ref[...], w_ref[...], preferred_element_type=jnp.float32)
    y = acc * s_ref[...] + b_ref[...]
    o_ref[...] = jnp.maximum(y, 0.0).astype(o_ref.dtype)


def odconv_block_call(patches, weights, scale, bias, residual=None,
                      out_dtype=jnp.float32):
    """Fused per-sample conv-as-matmul + scale/bias (+ residual) + ReLU.

    patches : (B, HW, CIK)   bf16 (or castable)
    weights : (B, CIK, CO)   f32/bf16 (cast to bf16)
    scale   : (B, 1, CO)     f32  (filter attention * folded BN scale)
    bias    : (1, CO)        f32  (folded BN bias)
    residual: (B, HW, CO) f32 or None
    returns : (B, HW, CO)    out_dtype
    """
    B, HW, CIK = patches.shape
    CO = weights.shape[-1]
    has_res = residual is not None
    out_bytes = jnp.dtype(out_dtype).itemsize

    # ---- N tiling: lane-dense output, single tile when CO <= 512 ------------
    Np = _round_up(CO, 128)
    if Np <= 512:
        tn = Np
    else:
        tn = max(t for t in (512, 384, 256, 128) if Np % t == 0)

    # ---- K: one full-dim block -> no K grid axis, no accumulator RMW --------
    tk = CIK

    # ---- M tiling under an explicit VMEM budget ------------------------------
    def tile_bytes(tm_):
        per = (tm_ * tk * 2          # patches tile (bf16)
               + tk * tn * 2         # weights tile (bf16)
               + 2 * tn * 4          # scale + bias tiles (f32)
               + tm_ * tn * out_bytes
               + (tm_ * tn * 4 if has_res else 0))
        return 2 * per               # double-buffered pipeline stages

    BUDGET = 40 << 20                # safe on v7x (64 MiB physical VMEM)
    tm = min(1024, _round_up(HW, 16))
    while tile_bytes(tm) > BUDGET and tm > 16:
        tm = max(16, _round_up(tm // 2, 16))
    Mp = _round_up(HW, tm)

    # ---- operand preparation (pad only when required) ------------------------
    p_p = patches.astype(jnp.bfloat16)
    if Mp != HW:
        p_p = jnp.pad(p_p, ((0, 0), (0, Mp - HW), (0, 0)))

    w_p = weights.astype(jnp.bfloat16)
    s_p = scale.astype(jnp.float32)
    b_p = bias.astype(jnp.float32)
    if Np != CO:
        w_p = jnp.pad(w_p, ((0, 0), (0, 0), (0, Np - CO)))
        s_p = jnp.pad(s_p, ((0, 0), (0, 0), (0, Np - CO)))
        b_p = jnp.pad(b_p, ((0, 0), (0, Np - CO)))

    grid = (B, Np // tn, Mp // tm)

    # Weight/scale/bias index maps do not depend on the M axis -> their tiles
    # stay resident across all M tiles for a given (b, n).
    in_specs = [
        pl.BlockSpec((pl.Squeezed(), tm, tk), lambda b, n, m: (b, m, 0)),
        pl.BlockSpec((pl.Squeezed(), tk, tn), lambda b, n, m: (b, 0, n)),
        pl.BlockSpec((pl.Squeezed(), 1, tn), lambda b, n, m: (b, 0, n)),
        pl.BlockSpec((1, tn), lambda b, n, m: (0, n)),
    ]
    args = [p_p, w_p, s_p, b_p]

    if has_res:
        r_p = residual.astype(jnp.float32)          # keep skip connection in f32
        if Mp != HW or Np != CO:
            r_p = jnp.pad(r_p, ((0, 0), (0, Mp - HW), (0, Np - CO)))
        in_specs.append(
            pl.BlockSpec((pl.Squeezed(), tm, tn), lambda b, n, m: (b, m, n)))
        args.append(r_p)
        kernel = _odconv_block_kernel_res
        res_bytes = B * Mp * Np * 4
    else:
        kernel = _odconv_block_kernel_nores
        res_bytes = 0

    flops = 2 * B * Mp * Np * tk
    bytes_accessed = (B * Mp * tk * 2 + B * tk * Np * 2 + B * Np * 4 + Np * 4
                      + res_bytes + B * Mp * Np * out_bytes)

    out = pl.pallas_call(
        kernel,
        out_shape=jax.ShapeDtypeStruct((B, Mp, Np), out_dtype),
        grid_spec=pltpu.PrefetchScalarGridSpec(
            num_scalar_prefetch=0,
            grid=grid,
            in_specs=in_specs,
            out_specs=pl.BlockSpec((pl.Squeezed(), tm, tn),
                                   lambda b, n, m: (b, m, n)),
        ),
        compiler_params=pltpu.CompilerParams(
            dimension_semantics=("parallel", "parallel", "parallel"),
            vmem_limit_bytes=int(min(max(tile_bytes(tm) + (8 << 20), 32 << 20),
                                     48 << 20)),
        ),
        cost_estimate=pl.CostEstimate(flops=flops, transcendentals=0,
                                      bytes_accessed=bytes_accessed),
    )(*args)

    if Mp != HW or Np != CO:
        out = out[:, :HW, :CO]
    return out


def _reference_block_call(patches, weights, scale, bias, residual=None):
    """Pure-JAX f32 reference of the fused kernel (for correctness check)."""
    y = jnp.einsum("bmk,bkn->bmn", patches.astype(jnp.float32),
                   weights.astype(jnp.float32))
    y = y * scale + bias
    if residual is not None:
        y = y + residual
    return jnp.maximum(y, 0.0)


# ----------------------------------------------------------------------------
# Glue: im2col, ODConv attention, parameter init (plain JAX — tiny tensors)
# ----------------------------------------------------------------------------
def im2col(x_nchw, k, stride, dilation):
    B, C, H, W = x_nchw.shape
    pad = dilation * (k - 1) // 2
    xp = jnp.pad(x_nchw, ((0, 0), (0, 0), (pad, pad), (pad, pad)))
    Ho = (H + 2 * pad - dilation * (k - 1) - 1) // stride + 1
    Wo = (W + 2 * pad - dilation * (k - 1) - 1) // stride + 1
    cols = []
    for kh in range(k):
        for kw in range(k):
            sl = xp[:, :,
                    kh * dilation: kh * dilation + (Ho - 1) * stride + 1: stride,
                    kw * dilation: kw * dilation + (Wo - 1) * stride + 1: stride]
            cols.append(sl)                       # (B, C, Ho, Wo)
    cols = jnp.stack(cols, axis=1)                # (B, k*k, C, Ho, Wo)
    cols = cols.transpose(0, 3, 4, 1, 2).reshape(B, Ho * Wo, k * k * C)
    return cols, Ho, Wo


def odconv_attention(x_nchw, p):
    # Global average pool -> 1x1 fc -> BN (eval) -> ReLU -> four heads.
    eps = 1e-5
    pooled = x_nchw.astype(jnp.float32).mean(axis=(2, 3))       # (B, Cin)
    h = pooled @ p["fc_w"].T
    h = (h - p["fc_bn_mean"]) / jnp.sqrt(p["fc_bn_var"] + eps)
    h = h * p["fc_bn_gamma"] + p["fc_bn_beta"]
    h = jnp.maximum(h, 0.0)
    ca = jax.nn.sigmoid(h @ p["ch_w"].T + p["ch_b"])             # (B, Cin)
    fa = jax.nn.sigmoid(h @ p["flt_w"].T + p["flt_b"])           # (B, Cout)
    sa = jax.nn.sigmoid(h @ p["sp_w"].T + p["sp_b"])             # (B, k*k)
    ka = jax.nn.softmax(h @ p["kr_w"].T + p["kr_b"], axis=-1)    # (B, E)
    return ca, fa, sa, ka


def odconv_bn_relu(x_nchw, odp, bnp, stride, residual, k=3, dilation=1,
                   use_pallas=True, out_dtype=jnp.float32):
    """ODConv -> (filter attention) -> BatchNorm(eval) -> (+ residual) -> ReLU.

    Valid because ODConv has bias=False and BN is in eval mode (BN folds into a
    per-channel scale/bias that commutes with the filter attention).
    """
    B = x_nchw.shape[0]
    ca, fa, sa, ka = odconv_attention(x_nchw, odp)

    xm = x_nchw.astype(jnp.float32) * ca[:, :, None, None]      # channel attention
    if use_pallas:
        # Fuse the bf16 cast into the im2col producer so the 9x-inflated
        # patches array hits HBM at half width and needs no later pad+cast.
        xm = xm.astype(jnp.bfloat16)
    patches, Ho, Wo = im2col(xm, k, stride, dilation)

    w = odp["weight"]                                            # (E, CO, CI, k, k)
    E, CO, CI, _, _ = w.shape
    # Expert aggregation as one (B,E) x (E, k*k*CI*CO) matmul + spatial scale.
    w_flat = w.transpose(0, 3, 4, 2, 1).reshape(E, k * k * CI * CO)
    agg = (ka @ w_flat).reshape(B, k * k, CI * CO)
    agg = agg * sa[:, :, None]
    wmat = agg.reshape(B, k * k * CI, CO)
    # TODO(synk): the expert bank could be DMA'd into the kernel and aggregated
    #             per-tile to avoid the per-sample wmat HBM round trip.

    # Fold eval-mode BatchNorm into scale/bias; filter attention folded into scale.
    eps = 1e-5
    s = bnp["gamma"] / jnp.sqrt(bnp["var"] + eps)
    bconst = bnp["beta"] - bnp["mean"] * s
    scale = (fa * s[None, :]).reshape(B, 1, CO).astype(jnp.float32)
    bias = bconst.reshape(1, CO).astype(jnp.float32)

    if residual is not None:
        residual = residual.astype(jnp.float32)

    if use_pallas:
        out = odconv_block_call(patches, wmat, scale, bias, residual,
                                out_dtype=out_dtype)
    else:
        out = _reference_block_call(patches.astype(jnp.float32),
                                    wmat.astype(jnp.float32),
                                    scale, bias, residual)
    return out.reshape(B, Ho, Wo, CO).transpose(0, 3, 1, 2)      # back to NCHW


def init_odconv_params(key, cin, cout, k, hidden_chans, expert_num, reduction=0.0625):
    hidden = max(int(cin * reduction), hidden_chans)
    ks = jax.random.split(key, 10)
    std = 0.1
    return dict(
        fc_w=jax.random.normal(ks[0], (hidden, cin), jnp.float32) * std,
        fc_bn_gamma=1.0 + 0.01 * jax.random.normal(ks[1], (hidden,), jnp.float32),
        fc_bn_beta=0.01 * jax.random.normal(ks[2], (hidden,), jnp.float32),
        fc_bn_mean=0.01 * jax.random.normal(ks[3], (hidden,), jnp.float32),
        fc_bn_var=1.0 + 0.1 * jnp.abs(jax.random.normal(ks[4], (hidden,), jnp.float32)),
        ch_w=jax.random.normal(ks[5], (cin, hidden), jnp.float32) * std,
        ch_b=jnp.zeros((cin,), jnp.float32),
        flt_w=jax.random.normal(ks[6], (cout, hidden), jnp.float32) * std,
        flt_b=jnp.zeros((cout,), jnp.float32),
        sp_w=jax.random.normal(ks[7], (k * k, hidden), jnp.float32) * std,
        sp_b=jnp.zeros((k * k,), jnp.float32),
        kr_w=jax.random.normal(ks[8], (expert_num, hidden), jnp.float32) * std,
        kr_b=jnp.zeros((expert_num,), jnp.float32),
        weight=jax.random.normal(ks[9], (expert_num, cout, cin, k, k), jnp.float32) * std,
    )


def init_bn_params(key, c):
    ks = jax.random.split(key, 4)
    return dict(
        gamma=1.0 + 0.01 * jax.random.normal(ks[0], (c,), jnp.float32),
        beta=0.01 * jax.random.normal(ks[1], (c,), jnp.float32),
        mean=0.01 * jax.random.normal(ks[2], (c,), jnp.float32),
        var=1.0 + 0.1 * jnp.abs(jax.random.normal(ks[3], (c,), jnp.float32)),
    )


# ----------------------------------------------------------------------------
# BasicBlock (expansion = 4)
# ----------------------------------------------------------------------------
EXPANSION = 4


def init_basic_block(key, in_chans, out_chans, expert_num=4, reduction=0.0625,
                     hidden_chans=16, k=3):
    k0, k1, k2, k3 = jax.random.split(key, 4)
    return dict(
        od1=init_odconv_params(k0, in_chans, out_chans, k, hidden_chans, expert_num, reduction),
        bn1=init_bn_params(k1, out_chans),
        od2=init_odconv_params(k2, out_chans, out_chans * EXPANSION, k, hidden_chans,
                               expert_num, reduction),
        bn2=init_bn_params(k3, out_chans * EXPANSION),
    )


def basic_block_forward(x_nchw, params, stride=1, use_pallas=True):
    # TODO(synk): groups != 1 and an explicit down_sample module are not exercised
    #             here (default BasicBlock config: groups=1, down_sample=None).
    B, C, H, W = x_nchw.shape
    # conv1 = ODConv -> BN1 -> ReLU (fused; no residual). Intermediate kept bf16
    # to halve HBM traffic into conv2 (which casts its patches to bf16 anyway).
    y = odconv_bn_relu(x_nchw, params["od1"], params["bn1"], stride=stride,
                       residual=None, use_pallas=use_pallas,
                       out_dtype=jnp.bfloat16 if use_pallas else jnp.float32)
    # conv2 = ODConv -> norm2 -> (+ identity, f32) -> ReLU (fused).
    identity = x_nchw.transpose(0, 2, 3, 1).reshape(B, H * W, C).astype(jnp.float32)
    y = odconv_bn_relu(y, params["od2"], params["bn2"], stride=1,
                       residual=identity, use_pallas=use_pallas,
                       out_dtype=jnp.float32)
    return y


# ----------------------------------------------------------------------------
if __name__ == "__main__":
    key = jax.random.PRNGKey(0)
    kx, kp = jax.random.split(key)

    # Residual add requires in_chans == out_chans * expansion (no down_sample), stride=1.
    B, IN_CHANS, H, W = 2, 16, 16, 16
    OUT_CHANS = 4                        # out_chans * 4 == in_chans

    x = jax.random.normal(kx, (B, IN_CHANS, H, W), jnp.float32)
    params = init_basic_block(kp, IN_CHANS, OUT_CHANS)

    fwd = jax.jit(lambda x_, p_: basic_block_forward(x_, p_, stride=1, use_pallas=True))
    out = jax.block_until_ready(fwd(x, params))

    assert out.shape == (B, OUT_CHANS * EXPANSION, H, W), out.shape
    assert bool(jnp.all(out >= 0.0)) and bool(jnp.all(jnp.isfinite(out)))

    # Correctness vs. pure-JAX f32 reference (kernel uses bf16 MXU operands and
    # a bf16 intermediate, so allow a generous tolerance).
    ref = jax.block_until_ready(
        basic_block_forward(x, params, stride=1, use_pallas=False))
    max_err = float(jnp.max(jnp.abs(out - ref)))
    assert bool(jnp.allclose(out, ref, atol=1e-1, rtol=1e-1)), max_err

    print("KERNEL_OK")
</pallas_src>

<mosaic_0001>
module attributes {stable_mosaic.version = 11 : i64} {
  func.func @_odconv_block_kernel_nores(%arg0: i32, %arg1: i32, %arg2: i32, %arg3: memref<1x256x144xbf16, #tpu.memory_space<vmem>>, %arg4: memref<1x144x128xbf16, #tpu.memory_space<vmem>>, %arg5: memref<1x1x128xf32, #tpu.memory_space<vmem>>, %arg6: memref<1x128xf32, #tpu.memory_space<vmem>>, %arg7: memref<1x256x128xbf16, #tpu.memory_space<vmem>>) attributes {dimension_semantics = [#tpu.dimension_semantics<parallel>, #tpu.dimension_semantics<parallel>, #tpu.dimension_semantics<parallel>], iteration_bounds = array<i64: 2, 1, 1>, scalar_prefetch = 0 : i64, scratch_operands = 0 : i64, tpu.core_type = #tpu.core_type<tc>, window_params = [{transform_indices = @transform_0, window_bounds = array<i64: 1, 256, 144>}, {transform_indices = @transform_1, window_bounds = array<i64: 1, 144, 128>}, {transform_indices = @transform_2, window_bounds = array<i64: 1, 1, 128>}, {transform_indices = @transform_3, window_bounds = array<i64: 1, 128>}, {transform_indices = @transform_4, window_bounds = array<i64: 1, 256, 128>}]} {
    %c0 = arith.constant 0 : index
    %c0_0 = arith.constant 0 : index
    %c0_1 = arith.constant 0 : index
    %0 = vector.load %arg3[%c0, %c0_0, %c0_1] : memref<1x256x144xbf16, #tpu.memory_space<vmem>>, vector<1x256x144xbf16>
    %1 = vector.shape_cast %0 : vector<1x256x144xbf16> to vector<256x144xbf16>
    %c0_2 = arith.constant 0 : index
    %c0_3 = arith.constant 0 : index
    %c0_4 = arith.constant 0 : index
    %2 = vector.load %arg4[%c0_2, %c0_3, %c0_4] : memref<1x144x128xbf16, #tpu.memory_space<vmem>>, vector<1x144x128xbf16>
    %3 = vector.shape_cast %2 : vector<1x144x128xbf16> to vector<144x128xbf16>
    %cst = arith.constant dense<0.000000e+00> : vector<256x128xf32>
    %4 = tpu.matmul %1, %3, %cst {dimension_numbers = #tpu.dot_dimension_numbers<[1], [0], [0], [1], [0, 0, 1, 1], [], []>} : vector<256x144xbf16>, vector<144x128xbf16>, vector<256x128xf32> -> vector<256x128xf32>
    %c0_5 = arith.constant 0 : index
    %c0_6 = arith.constant 0 : index
    %c0_7 = arith.constant 0 : index
    %5 = vector.load %arg5[%c0_5, %c0_6, %c0_7] : memref<1x1x128xf32, #tpu.memory_space<vmem>>, vector<1x1x128xf32>
    %6 = vector.shape_cast %5 : vector<1x1x128xf32> to vector<1x128xf32>
    %7 = vector.broadcast %6 : vector<1x128xf32> to vector<256x128xf32>
    %8 = arith.mulf %4, %7 : vector<256x128xf32>
    %c0_8 = arith.constant 0 : index
    %c0_9 = arith.constant 0 : index
    %9 = vector.load %arg6[%c0_8, %c0_9] : memref<1x128xf32, #tpu.memory_space<vmem>>, vector<1x128xf32>
    %10 = vector.broadcast %9 : vector<1x128xf32> to vector<256x128xf32>
    %11 = arith.addf %8, %10 : vector<256x128xf32>
    %cst_10 = arith.constant 0.000000e+00 : f32
    %12 = vector.broadcast %cst_10 : f32 to vector<256x128xf32>
    %13 = arith.maximumf %11, %12 : vector<256x128xf32>
    %14 = arith.truncf %13 : vector<256x128xf32> to vector<256x128xbf16>
    %c0_11 = arith.constant 0 : index
    %c0_12 = arith.constant 0 : index
    %c0_13 = arith.constant 0 : index
    %15 = vector.load %arg7[%c0_11, %c0_12, %c0_13] : memref<1x256x128xbf16, #tpu.memory_space<vmem>>, vector<1x256x128xbf16>
    %16 = vector.shape_cast %15 : vector<1x256x128xbf16> to vector<256x128xbf16>
    %17 = vector.shape_cast %14 : vector<256x128xbf16> to vector<1x256x128xbf16>
    tpu.vector_store %arg7[%c0_11, %c0_12, %c0_13], %17 {strides = array<i32>} : memref<1x256x128xbf16, #tpu.memory_space<vmem>>, vector<1x256x128xbf16>,
    return
  }
  func.func @transform_0(%arg0: i32, %arg1: i32, %arg2: i32) -> (i32, i32, i32) {
    %c0_i32 = arith.constant 0 : i32
    %c0_i32_0 = arith.constant 0 : i32
    return %arg0, %arg2, %c0_i32 : i32, i32, i32
  }
  func.func @transform_1(%arg0: i32, %arg1: i32, %arg2: i32) -> (i32, i32, i32) {
    %c0_i32 = arith.constant 0 : i32
    %c0_i32_0 = arith.constant 0 : i32
    return %arg0, %c0_i32, %arg1 : i32, i32, i32
  }
  func.func @transform_2(%arg0: i32, %arg1: i32, %arg2: i32) -> (i32, i32, i32) {
    %c0_i32 = arith.constant 0 : i32
    %c0_i32_0 = arith.constant 0 : i32
    return %arg0, %c0_i32, %arg1 : i32, i32, i32
  }
  func.func @transform_3(%arg0: i32, %arg1: i32, %arg2: i32) -> (i32, i32) {
    %c0_i32 = arith.constant 0 : i32
    %c0_i32_0 = arith.constant 0 : i32
    return %c0_i32, %arg1 : i32, i32
  }
  func.func @transform_4(%arg0: i32, %arg1: i32, %arg2: i32) -> (i32, i32, i32) {
    %c0_i32 = arith.constant 0 : i32
    return %arg0, %arg2, %arg1 : i32, i32, i32
  }
}

module attributes {stable_mosaic.version = 11 : i64} {
  func.func @_odconv_block_kernel_res(%arg0: i32, %arg1: i32, %arg2: i32, %arg3: memref<1x256x36xbf16, #tpu.memory_space<vmem>>, %arg4: memref<1x36x128xbf16, #tpu.memory_space<vmem>>, %arg5: memref<1x1x128xf32, #tpu.memory_space<vmem>>, %arg6: memref<1x128xf32, #tpu.memory_space<vmem>>, %arg7: memref<1x256x128xf32, #tpu.memory_space<vmem>>, %arg8: memref<1x256x128xf32, #tpu.memory_space<vmem>>) attributes {dimension_semantics = [#tpu.dimension_semantics<parallel>, #tpu.dimension_semantics<parallel>, #tpu.dimension_semantics<parallel>], iteration_bounds = array<i64: 2, 1, 1>, scalar_prefetch = 0 : i64, scratch_operands = 0 : i64, tpu.core_type = #tpu.core_type<tc>, window_params = [{transform_indices = @transform_0, window_bounds = array<i64: 1, 256, 36>}, {transform_indices = @transform_1, window_bounds = array<i64: 1, 36, 128>}, {transform_indices = @transform_2, window_bounds = array<i64: 1, 1, 128>}, {transform_indices = @transform_3, window_bounds = array<i64: 1, 128>}, {transform_indices = @transform_4, window_bounds = array<i64: 1, 256, 128>}, {transform_indices = @transform_5, window_bounds = array<i64: 1, 256, 128>}]} {
    %c0 = arith.constant 0 : index
    %c0_0 = arith.constant 0 : index
    %c0_1 = arith.constant 0 : index
    %0 = vector.load %arg3[%c0, %c0_0, %c0_1] : memref<1x256x36xbf16, #tpu.memory_space<vmem>>, vector<1x256x36xbf16>
    %1 = vector.shape_cast %0 : vector<1x256x36xbf16> to vector<256x36xbf16>
    %c0_2 = arith.constant 0 : index
    %c0_3 = arith.constant 0 : index
    %c0_4 = arith.constant 0 : index
    %2 = vector.load %arg4[%c0_2, %c0_3, %c0_4] : memref<1x36x128xbf16, #tpu.memory_space<vmem>>, vector<1x36x128xbf16>
    %3 = vector.shape_cast %2 : vector<1x36x128xbf16> to vector<36x128xbf16>
    %cst = arith.constant dense<0.000000e+00> : vector<256x128xf32>
    %4 = tpu.matmul %1, %3, %cst {dimension_numbers = #tpu.dot_dimension_numbers<[1], [0], [0], [1], [0, 0, 1, 1], [], []>} : vector<256x36xbf16>, vector<36x128xbf16>, vector<256x128xf32> -> vector<256x128xf32>
    %c0_5 = arith.constant 0 : index
    %c0_6 = arith.constant 0 : index
    %c0_7 = arith.constant 0 : index
    %5 = vector.load %arg5[%c0_5, %c0_6, %c0_7] : memref<1x1x128xf32, #tpu.memory_space<vmem>>, vector<1x1x128xf32>
    %6 = vector.shape_cast %5 : vector<1x1x128xf32> to vector<1x128xf32>
    %7 = vector.broadcast %6 : vector<1x128xf32> to vector<256x128xf32>
    %8 = arith.mulf %4, %7 : vector<256x128xf32>
    %c0_8 = arith.constant 0 : index
    %c0_9 = arith.constant 0 : index
    %9 = vector.load %arg6[%c0_8, %c0_9] : memref<1x128xf32, #tpu.memory_space<vmem>>, vector<1x128xf32>
    %10 = vector.broadcast %9 : vector<1x128xf32> to vector<256x128xf32>
    %11 = arith.addf %8, %10 : vector<256x128xf32>
    %c0_10 = arith.constant 0 : index
    %c0_11 = arith.constant 0 : index
    %c0_12 = arith.constant 0 : index
    %12 = vector.load %arg7[%c0_10, %c0_11, %c0_12] : memref<1x256x128xf32, #tpu.memory_space<vmem>>, vector<1x256x128xf32>
    %13 = vector.shape_cast %12 : vector<1x256x128xf32> to vector<256x128xf32>
    %14 = arith.addf %11, %13 : vector<256x128xf32>
    %cst_13 = arith.constant 0.000000e+00 : f32
    %15 = vector.broadcast %cst_13 : f32 to vector<256x128xf32>
    %16 = arith.maximumf %14, %15 : vector<256x128xf32>
    %c0_14 = arith.constant 0 : index
    %c0_15 = arith.constant 0 : index
    %c0_16 = arith.constant 0 : index
    %17 = vector.load %arg8[%c0_14, %c0_15, %c0_16] : memref<1x256x128xf32, #tpu.memory_space<vmem>>, vector<1x256x128xf32>
    %18 = vector.shape_cast %17 : vector<1x256x128xf32> to vector<256x128xf32>
    %19 = vector.shape_cast %16 : vector<256x128xf32> to vector<1x256x128xf32>
    tpu.vector_store %arg8[%c0_14, %c0_15, %c0_16], %19 {strides = array<i32>} : memref<1x256x128xf32, #tpu.memory_space<vmem>>, vector<1x256x128xf32>,
    return
  }
  func.func @transform_0(%arg0: i32, %arg1: i32, %arg2: i32) -> (i32, i32, i32) {
    %c0_i32 = arith.constant 0 : i32
    %c0_i32_0 = arith.constant 0 : i32
    return %arg0, %arg2, %c0_i32 : i32, i32, i32
  }
  func.func @transform_1(%arg0: i32, %arg1: i32, %arg2: i32) -> (i32, i32, i32) {
    %c0_i32 = arith.constant 0 : i32
    %c0_i32_0 = arith.constant 0 : i32
    return %arg0, %c0_i32, %arg1 : i32, i32, i32
  }
  func.func @transform_2(%arg0: i32, %arg1: i32, %arg2: i32) -> (i32, i32, i32) {
    %c0_i32 = arith.constant 0 : i32
    %c0_i32_0 = arith.constant 0 : i32
    return %arg0, %c0_i32, %arg1 : i32, i32, i32
  }
  func.func @transform_3(%arg0: i32, %arg1: i32, %arg2: i32) -> (i32, i32) {
    %c0_i32 = arith.constant 0 : i32
    %c0_i32_0 = arith.constant 0 : i32
    return %c0_i32, %arg1 : i32, i32
  }
  func.func @transform_4(%arg0: i32, %arg1: i32, %arg2: i32) -> (i32, i32, i32) {
    %c0_i32 = arith.constant 0 : i32
    return %arg0, %arg2, %arg1 : i32, i32, i32
  }
  func.func @transform_5(%arg0: i32, %arg1: i32, %arg2: i32) -> (i32, i32, i32) {
    %c0_i32 = arith.constant 0 : i32
    return %arg0, %arg2, %arg1 : i32, i32, i32
  }
}

</mosaic_0001>

<bundles_post_ra>
// kernel: _lambda_.2
= control target key start
LH: loop header
LB: loop body
LE: loop exit
PB: predicated region body
PF: predicated region fallthrough
CT: control target
= control target key end

     0   :  { %s1583_s15 = smov 0   ;;  %s1585_s16 = smov 0   ;;  %s1778_s0 = inlined_call_operand.vmem [shape: bf16[2,256,144], index: 0, kind: input, shape index: {}]   ;;  %s1779_s1 = inlined_call_operand.vmem [shape: bf16[2,144,128], index: 1, kind: input, shape index: {}]   ;;  %s1780_s2 = inlined_call_operand.vmem [shape: f32[2,1,128], index: 2, kind: input, shape index: {}]   ;;  %s1781_s3 = inlined_call_operand.vmem [shape: f32[1,128], index: 3, kind: input, shape index: {}]   ;;  %s1782_s4 = inlined_call_operand.vmem [shape: bf16[2,256,128], index: 4, kind: output, shape index: {}]  }
   0x1   :  { %s1587_s17 = smov 0  }
   0x2 LB: > { %s33_s18 = sadd.s32 1, %s1551_s16  ;;  %p1204_p0 = scmp.ge.s32.totalorder %s1555_s17, 1  ;;  %s1555_s17 = sphi %s1587_s17, %s14_s17   ;;  %s1551_s16 = sphi %s1585_s16, %s1784_s16   ;;  %s1547_s15 = sphi %s1583_s15, %s1783_s15  }
   0x3   : > { %p35_p1 = scmp.ge.s32.totalorder %s33_s18, 2  ;;  %p229_p2 = scmp.lt.s32.totalorder %s1555_s17, 3 }
   0x5   : > { %s1786_s18 = smov (%p35_p1, %s33_s18), 0  ;;  %p230_p3 = pnand %p1204_p0, %p229_p2 }
   0x6   : > { %p285_p4 = scmp.lt.s32.totalorder (!%p230_p3), %s1547_s15, 1  ;;  %v1557_v0 = vmov (!%p230_p3), 0   ;;  %vm574_vm0 = vcmask (!%p230_p3), 130048   ;;  %v1681_v44 = vld [vmem:[%s1781_s3] ss:$0 sm:$0xff] (!%p230_p3) }
   0x7   : > { %233 = sbr.rel (%p230_p3) target bundleno = 334 (0x14e), region = 36  ;;  %623 = vmatprep.subr.bf16.mxu0 (!%p230_p3), %v1557_v0  ;;  %1432 = vmatprep.subr.bf16.mxu1 (!%p230_p3), %v1557_v0 }
   0xe   : > { %s1788_s15 = smov (!%p285_p4, %s1547_s15), 1 }
   0xf   : > { %s1303_s19 = sshll.u32 %s1788_s15, 8  ;;  %s1450_s20 = smul.u32 72, %s1788_s15 }
  0x10   : > { %s1608_s23 = scalar_lea.vmem %s1778_s0, %s1303_s19  ;;  %s308_s29 = scalar_lea.vmem %s1780_s2, %s1788_s15 }
  0x11   : > { %s1613_s26 = scalar_lea.vmem %s1779_s1, %s1450_s20  ;;  %v1487_v4 = vld [vmem:[%s1608_s23 + $0x4] ss:$8 sps:$4 sm:$0xff]   ;;  %v1485_v12 = vld [vmem:[%s1608_s23] ss:$8 sps:$4 sm:$0xff]   ;;  %v1491_v14 = vld [vmem:[%s1608_s23 + $0x14] ss:$8 sps:$4 sm:$0xff]  }
  0x12   : > { %v1476_v1 = vld [vmem:[%s1613_s26] sm:$0xff]   ;;  %v1477_v2 = vld [vmem:[%s1613_s26 + $0x8] sm:$0xff]   ;;  %v1478_v3 = vld [vmem:[%s1613_s26 + $0x10] sm:$0xff]   ;;  %1251 = vmatprep.mubr.msk.bf16.mxu0 %vm574_vm0, %v1487_v4  ;;  %s1304_s6 = sshll.u32 %s1788_s15, 7 }
  0x13   : > { %624 = vmatpush1.bf16.msra.mxu0 %v1476_v1  ;;  %1441 = vmatpush1.bf16.msra.mxu1 %v1476_v1  ;;  %v1479_v5 = vld [vmem:[%s1613_s26 + $0x18] sm:$0xff]   ;;  %v1490_v6 = vld [vmem:[%s1608_s23 + $0x84] ss:$8 sps:$4 sm:$0xff]   ;;  %v1482_v9 = vld [vmem:[%s1613_s26 + $0x30] sm:$0xff]   ;;  %s1695_s9 = scalar_lea.vmem %s1782_s4, %s1304_s6 }
  0x14   : > { %625 = vmatprep.subr.bf16.mxu0 %v1557_v0  ;;  %1433 = vmatprep.subr.bf16.mxu1 %v1557_v0  ;;  %v1480_v7 = vld [vmem:[%s1613_s26 + $0x20] sm:$0xff]   ;;  %v1481_v8 = vld [vmem:[%s1613_s26 + $0x28] sm:$0xff]   ;;  %v1483_v10 = vld [vmem:[%s1613_s26 + $0x38] sm:$0xff]  }
  0x15   : > { %1259 = vmatprep.mubr.msk.bf16.mxu1 %vm574_vm0, %v1490_v6  ;;  %v1484_v11 = vld [vmem:[%s1613_s26 + $0x40] sm:$0xff]   ;;  %v1493_v15 = vld [vmem:[%s1608_s23 + $0x94] ss:$8 sps:$4 sm:$0xff]   ;;  %v1495_v16 = vld [vmem:[%s1608_s23 + $0x10] ss:$8 sps:$4 sm:$0xff]  }
  0x16   : > { %v1488_v13 = vld [vmem:[%s1608_s23 + $0x80] ss:$8 sps:$4 sm:$0xff]   ;;  %v1496_v17 = vld [vmem:[%s1608_s23 + $0x90] ss:$8 sps:$4 sm:$0xff]   ;;  %v1497_v18 = vld [vmem:[%s1608_s23 + $0x24] ss:$8 sps:$4 sm:$0xff]  }
  0x17   : > { %626 = vmatpush1.bf16.msra.mxu0 %v1477_v2  ;;  %1442 = vmatpush1.bf16.msra.mxu1 %v1477_v2  ;;  %v1499_v19 = vld [vmem:[%s1608_s23 + $0xa4] ss:$8 sps:$4 sm:$0xff]   ;;  %v1501_v20 = vld [vmem:[%s1608_s23 + $0x20] ss:$8 sps:$4 sm:$0xff]   ;;  %v1503_v22 = vld [vmem:[%s1608_s23 + $0x34] ss:$8 sps:$4 sm:$0xff]  }
  0x18   : > { %627 = vmatprep.subr.bf16.mxu0 %v1557_v0  ;;  %1434 = vmatprep.subr.bf16.mxu1 %v1557_v0  ;;  %v1502_v21 = vld [vmem:[%s1608_s23 + $0xa0] ss:$8 sps:$4 sm:$0xff]   ;;  %v1505_v23 = vld [vmem:[%s1608_s23 + $0xb4] ss:$8 sps:$4 sm:$0xff]   ;;  %v1507_v24 = vld [vmem:[%s1608_s23 + $0x30] ss:$8 sps:$4 sm:$0xff]  }
  0x19   : > { %v1508_v25 = vld [vmem:[%s1608_s23 + $0xb0] ss:$8 sps:$4 sm:$0xff]   ;;  %v1509_v26 = vld [vmem:[%s1608_s23 + $0x44] ss:$8 sps:$4 sm:$0xff]   ;;  %v1513_v28 = vld [vmem:[%s1608_s23 + $0x40] ss:$8 sps:$4 sm:$0xff]  }
  0x1a   : > { %v1511_v27 = vld [vmem:[%s1608_s23 + $0xc4] ss:$8 sps:$4 sm:$0xff]   ;;  %v1514_v29 = vld [vmem:[%s1608_s23 + $0xc0] ss:$8 sps:$4 sm:$0xff]   ;;  %v1515_v30 = vld [vmem:[%s1608_s23 + $0x54] ss:$8 sps:$4 sm:$0xff]  }
  0x1b   : > { %628 = vmatpush1.bf16.msra.mxu0 %v1478_v3  ;;  %1443 = vmatpush1.bf16.msra.mxu1 %v1478_v3  ;;  %v1517_v31 = vld [vmem:[%s1608_s23 + $0xd4] ss:$8 sps:$4 sm:$0xff]   ;;  %v1519_v32 = vld [vmem:[%s1608_s23 + $0x50] ss:$8 sps:$4 sm:$0xff]   ;;  %v1521_v34 = vld [vmem:[%s1608_s23 + $0x64] ss:$8 sps:$4 sm:$0xff]  }
  0x1c   : > { %629 = vmatprep.subr.bf16.mxu0 %v1557_v0  ;;  %1435 = vmatprep.subr.bf16.mxu1 %v1557_v0  ;;  %v1520_v33 = vld [vmem:[%s1608_s23 + $0xd0] ss:$8 sps:$4 sm:$0xff]   ;;  %v1523_v35 = vld [vmem:[%s1608_s23 + $0xe4] ss:$8 sps:$4 sm:$0xff]   ;;  %v1525_v36 = vld [vmem:[%s1608_s23 + $0x60] ss:$8 sps:$4 sm:$0xff]  }
  0x1d   : > { %v1526_v37 = vld [vmem:[%s1608_s23 + $0xe0] ss:$8 sps:$4 sm:$0xff]   ;;  %v1527_v38 = vld [vmem:[%s1608_s23 + $0x74] ss:$8 sps:$4 sm:$0xff]   ;;  %v1531_v40 = vld [vmem:[%s1608_s23 + $0x70] ss:$8 sps:$4 sm:$0xff]  }
  0x1e   : > { %v1529_v39 = vld [vmem:[%s1608_s23 + $0xf4] ss:$8 sps:$4 sm:$0xff]   ;;  %v1532_v41 = vld [vmem:[%s1608_s23 + $0xf0] ss:$8 sps:$4 sm:$0xff]   ;;  %v1676_v42 = vld [vmem:[%s308_s29] ss:$0 sm:$0xff] }
  0x1f   : > { %630 = vmatpush1.bf16.msra.mxu0 %v1479_v5  ;;  %1444 = vmatpush1.bf16.msra.mxu1 %v1479_v5 }
  0x20   : > { %631 = vmatprep.subr.bf16.mxu0 %v1557_v0  ;;  %1436 = vmatprep.subr.bf16.mxu1 %v1557_v0 }
  0x23   : > { %632 = vmatpush1.bf16.msra.mxu0 %v1480_v7  ;;  %1445 = vmatpush1.bf16.msra.mxu1 %v1480_v7 }
  0x24   : > { %633 = vmatprep.subr.bf16.mxu0 %v1557_v0  ;;  %1437 = vmatprep.subr.bf16.mxu1 %v1557_v0 }
  0x27   : > { %634 = vmatpush1.bf16.msra.mxu0 %v1481_v8  ;;  %1446 = vmatpush1.bf16.msra.mxu1 %v1481_v8 }
  0x28   : > { %635 = vmatprep.subr.bf16.mxu0 %v1557_v0  ;;  %1438 = vmatprep.subr.bf16.mxu1 %v1557_v0 }
  0x2b   : > { %636 = vmatpush1.bf16.msra.mxu0 %v1482_v9  ;;  %1447 = vmatpush1.bf16.msra.mxu1 %v1482_v9 }
  0x2c   : > { %637 = vmatprep.subr.bf16.mxu0 %v1557_v0  ;;  %1439 = vmatprep.subr.bf16.mxu1 %v1557_v0 }
  0x2f   : > { %638 = vmatpush1.bf16.msra.mxu0 %v1483_v10  ;;  %1448 = vmatpush1.bf16.msra.mxu1 %v1483_v10 }
  0x30   : > { %639 = vmatprep.subr.bf16.mxu0 %v1557_v0  ;;  %1440 = vmatprep.subr.bf16.mxu1 %v1557_v0 }
  0x33   : > { %640 = vmatpush1.bf16.msra.mxu0 %v1484_v11  ;;  %1449 = vmatpush1.bf16.msra.mxu1 %v1484_v11 }
  0x36   : > { %656 = vmatmul.mubr.bf16.vlgmr.msra.gmra.mrb[0].mxu0 %v1485_v12  ;;  %720 = vmatmul.mubr.bf16.vlgmr.msra.gmra.mrb[0].mxu1 %v1488_v13 }
  0x37   : > { %1252 = vmatprep.mubr.msk.bf16.mxu0 %vm574_vm0, %v1491_v14  ;;  %1260 = vmatprep.mubr.msk.bf16.mxu1 %vm574_vm0, %v1493_v15 }
  0x3e   : > { %664 = vmatmul.mubr.bf16.gmra.mrb[4].mxu0 %v1495_v16  ;;  %728 = vmatmul.mubr.bf16.gmra.mrb[4].mxu1 %v1496_v17 }
  0x3f   : > { %1253 = vmatprep.mubr.msk.bf16.mxu0 %vm574_vm0, %v1497_v18  ;;  %1261 = vmatprep.mubr.msk.bf16.mxu1 %vm574_vm0, %v1499_v19 }
  0x46   : > { %672 = vmatmul.mubr.bf16.gmra.mrb[8].mxu0 %v1501_v20  ;;  %736 = vmatmul.mubr.bf16.gmra.mrb[8].mxu1 %v1502_v21 }
  0x47   : > { %1254 = vmatprep.mubr.msk.bf16.mxu0 %vm574_vm0, %v1503_v22  ;;  %1262 = vmatprep.mubr.msk.bf16.mxu1 %vm574_vm0, %v1505_v23 }
  0x4e   : > { %680 = vmatmul.mubr.bf16.gmra.mrb[12].mxu0 %v1507_v24  ;;  %744 = vmatmul.mubr.bf16.gmra.mrb[12].mxu1 %v1508_v25 }
  0x4f   : > { %1255 = vmatprep.mubr.msk.bf16.mxu0 %vm574_vm0, %v1509_v26  ;;  %1263 = vmatprep.mubr.msk.bf16.mxu1 %vm574_vm0, %v1511_v27 }
  0x56   : > { %688 = vmatmul.mubr.bf16.gmra.mrb[16].mxu0 %v1513_v28  ;;  %752 = vmatmul.mubr.bf16.gmra.mrb[16].mxu1 %v1514_v29 }
  0x57   : > { %1256 = vmatprep.mubr.msk.bf16.mxu0 %vm574_vm0, %v1515_v30  ;;  %1264 = vmatprep.mubr.msk.bf16.mxu1 %vm574_vm0, %v1517_v31 }
  0x5e   : > { %696 = vmatmul.mubr.bf16.gmra.mrb[20].mxu0 %v1519_v32  ;;  %760 = vmatmul.mubr.bf16.gmra.mrb[20].mxu1 %v1520_v33 }
  0x5f   : > { %1257 = vmatprep.mubr.msk.bf16.mxu0 %vm574_vm0, %v1521_v34  ;;  %1265 = vmatprep.mubr.msk.bf16.mxu1 %vm574_vm0, %v1523_v35 }
  0x66   : > { %704 = vmatmul.mubr.bf16.gmra.mrb[24].mxu0 %v1525_v36  ;;  %768 = vmatmul.mubr.bf16.gmra.mrb[24].mxu1 %v1526_v37 }
  0x67   : > { %1258 = vmatprep.mubr.msk.bf16.mxu0 %vm574_vm0, %v1527_v38  ;;  %1266 = vmatprep.mubr.msk.bf16.mxu1 %vm574_vm0, %v1529_v39 }
  0x6e   : > { %712 = vmatmul.mubr.bf16.gmra.mrb[28].mxu0 %v1531_v40  ;;  %776 = vmatmul.mubr.bf16.gmra.mrb[28].mxu1 %v1532_v41 }
 0x109   : > { %v657_v43 = vpop.f32.mrb[0].mxu0  ;;  %v721_v45 = vpop.f32.mrb[0].mxu1 }
 0x10a   : > { %v791_v46 = vmul.f32 %v1676_v42, %v657_v43  ;;  %v807_v47 = vmul.f32 %v1676_v42, %v721_v45  ;;  %v659_v48 = vpop.f32.mrb[1].mxu0  ;;  %v723_v49 = vpop.f32.mrb[1].mxu1 }
 0x10b   : > { %v660_v50 = vpop.f32.mrb[2].mxu0  ;;  %v724_v51 = vpop.f32.mrb[2].mxu1 }
 0x10c   : > { %v830_v52 = vadd.f32 %v1681_v44, %v791_v46  ;;  %v846_v53 = vadd.f32 %v1681_v44, %v807_v47  ;;  %v792_v54 = vmul.f32 %v1676_v42, %v660_v50  ;;  %v808_v55 = vmul.f32 %v1676_v42, %v724_v51  ;;  %v662_v56 = vpop.f32.mrb[3].mxu0  ;;  %v726_v57 = vpop.f32.mrb[3].mxu1 }
 0x10e   : > { %v831_v58 = vadd.f32 %v1681_v44, %v792_v54  ;;  %v847_v59 = vadd.f32 %v1681_v44, %v808_v55  ;;  %v862_v60 = vmax.f32 %v830_v52, 0.0  ;;  %v878_v61 = vmax.f32 %v846_v53, 0.0 }
 0x110   : > { %v863_v62 = vmax.f32 %v831_v58, 0.0  ;;  %v879_v63 = vmax.f32 %v847_v59, 0.0 }
 0x111   : > { %v665_v0 = vpop.f32.mrb[4].mxu0  ;;  %v729_v1 = vpop.f32.mrb[4].mxu1 }
 0x112   : > { %v1340_v2 = vpack.c.bf16 %v863_v62, %v862_v60  ;;  %v1380_v3 = vpack.c.bf16 %v879_v63, %v878_v61  ;;  %v793_v4 = vmul.f32 %v1676_v42, %v665_v0  ;;  %v809_v5 = vmul.f32 %v1676_v42, %v729_v1  ;;  %v667_v6 = vpop.f32.mrb[5].mxu0  ;;  %v731_v7 = vpop.f32.mrb[5].mxu1 }
 0x113   : > { %v668_v8 = vpop.f32.mrb[6].mxu0  ;;  %v732_v9 = vpop.f32.mrb[6].mxu1 }
 0x114   : > { %1341 = vst [vmem:[%s1695_s9] sm:$0xff] %v1340_v2   ;;  %1424 = vst [vmem:[%s1695_s9 + $0x40] sm:$0xff] %v1380_v3   ;;  %v832_v10 = vadd.f32 %v1681_v44, %v793_v4  ;;  %v848_v11 = vadd.f32 %v1681_v44, %v809_v5  ;;  %v794_v12 = vmul.f32 %v1676_v42, %v668_v8  ;;  %v670_v14 = vpop.f32.mrb[7].mxu0  ;;  %v734_v15 = vpop.f32.mrb[7].mxu1 }
 0x115   : > { %v810_v13 = vmul.f32 %v1676_v42, %v732_v9 }
 0x116   : > { %v833_v16 = vadd.f32 %v1681_v44, %v794_v12  ;;  %v864_v18 = vmax.f32 %v832_v10, 0.0  ;;  %v880_v19 = vmax.f32 %v848_v11, 0.0 }
 0x117   : > { %v849_v17 = vadd.f32 %v1681_v44, %v810_v13 }
 0x118   : > { %v865_v20 = vmax.f32 %v833_v16, 0.0 }
 0x119   : > { %v881_v21 = vmax.f32 %v849_v17, 0.0  ;;  %v673_v22 = vpop.f32.mrb[8].mxu0  ;;  %v737_v23 = vpop.f32.mrb[8].mxu1 }
 0x11a   : > { %v1345_v24 = vpack.c.bf16 %v865_v20, %v864_v18  ;;  %v795_v26 = vmul.f32 %v1676_v42, %v673_v22  ;;  %v811_v27 = vmul.f32 %v1676_v42, %v737_v23  ;;  %v675_v28 = vpop.f32.mrb[9].mxu0  ;;  %v739_v29 = vpop.f32.mrb[9].mxu1 }
 0x11b   : > { %v1385_v25 = vpack.c.bf16 %v881_v21, %v880_v19  ;;  %v676_v30 = vpop.f32.mrb[10].mxu0  ;;  %v740_v31 = vpop.f32.mrb[10].mxu1 }
 0x11c   : > { %1417 = vst [vmem:[%s1695_s9 + $0x8] sm:$0xff] %v1345_v24   ;;  %v834_v32 = vadd.f32 %v1681_v44, %v795_v26  ;;  %v850_v33 = vadd.f32 %v1681_v44, %v811_v27  ;;  %v796_v34 = vmul.f32 %v1676_v42, %v676_v30  ;;  %v812_v35 = vmul.f32 %v1676_v42, %v740_v31  ;;  %v678_v36 = vpop.f32.mrb[11].mxu0  ;;  %v742_v37 = vpop.f32.mrb[11].mxu1 }
 0x11d   : > { %1425 = vst [vmem:[%s1695_s9 + $0x48] sm:$0xff] %v1385_v25  }
 0x11e   : > { %v835_v38 = vadd.f32 %v1681_v44, %v796_v34  ;;  %v851_v39 = vadd.f32 %v1681_v44, %v812_v35  ;;  %v866_v40 = vmax.f32 %v834_v32, 0.0  ;;  %v882_v41 = vmax.f32 %v850_v33, 0.0 }
 0x120   : > { %v867_v43 = vmax.f32 %v835_v38, 0.0  ;;  %v883_v45 = vmax.f32 %v851_v39, 0.0 }
 0x121   : > { %v681_v46 = vpop.f32.mrb[12].mxu0  ;;  %v745_v47 = vpop.f32.mrb[12].mxu1 }
 0x122   : > { %v1350_v48 = vpack.c.bf16 %v867_v43, %v866_v40  ;;  %v1390_v49 = vpack.c.bf16 %v883_v45, %v882_v41  ;;  %v797_v50 = vmul.f32 %v1676_v42, %v681_v46  ;;  %v813_v51 = vmul.f32 %v1676_v42, %v745_v47  ;;  %v683_v52 = vpop.f32.mrb[13].mxu0  ;;  %v747_v53 = vpop.f32.mrb[13].mxu1 }
 0x123   : > { %v684_v54 = vpop.f32.mrb[14].mxu0  ;;  %v748_v55 = vpop.f32.mrb[14].mxu1 }
 0x124   : > { %1418 = vst [vmem:[%s1695_s9 + $0x10] sm:$0xff] %v1350_v48   ;;  %1426 = vst [vmem:[%s1695_s9 + $0x50] sm:$0xff] %v1390_v49   ;;  %v836_v56 = vadd.f32 %v1681_v44, %v797_v50  ;;  %v852_v57 = vadd.f32 %v1681_v44, %v813_v51  ;;  %v798_v58 = vmul.f32 %v1676_v42, %v684_v54  ;;  %v686_v60 = vpop.f32.mrb[15].mxu0  ;;  %v750_v61 = vpop.f32.mrb[15].mxu1 }
 0x125   : > { %v814_v59 = vmul.f32 %v1676_v42, %v748_v55 }
 0x126   : > { %v837_v62 = vadd.f32 %v1681_v44, %v798_v58  ;;  %v868_v0 = vmax.f32 %v836_v56, 0.0  ;;  %v884_v1 = vmax.f32 %v852_v57, 0.0 }
 0x127   : > { %v853_v63 = vadd.f32 %v1681_v44, %v814_v59 }
 0x128   : > { %v869_v2 = vmax.f32 %v837_v62, 0.0 }
 0x129   : > { %v885_v3 = vmax.f32 %v853_v63, 0.0  ;;  %v689_v4 = vpop.f32.mrb[16].mxu0  ;;  %v753_v5 = vpop.f32.mrb[16].mxu1 }
 0x12a   : > { %v1355_v6 = vpack.c.bf16 %v869_v2, %v868_v0  ;;  %v799_v8 = vmul.f32 %v1676_v42, %v689_v4  ;;  %v815_v9 = vmul.f32 %v1676_v42, %v753_v5  ;;  %v691_v10 = vpop.f32.mrb[17].mxu0  ;;  %v755_v11 = vpop.f32.mrb[17].mxu1 }
 0x12b   : > { %v1395_v7 = vpack.c.bf16 %v885_v3, %v884_v1  ;;  %v692_v12 = vpop.f32.mrb[18].mxu0  ;;  %v756_v13 = vpop.f32.mrb[18].mxu1 }
 0x12c   : > { %1419 = vst [vmem:[%s1695_s9 + $0x18] sm:$0xff] %v1355_v6   ;;  %v838_v14 = vadd.f32 %v1681_v44, %v799_v8  ;;  %v854_v15 = vadd.f32 %v1681_v44, %v815_v9  ;;  %v800_v16 = vmul.f32 %v1676_v42, %v692_v12  ;;  %v816_v17 = vmul.f32 %v1676_v42, %v756_v13  ;;  %v694_v18 = vpop.f32.mrb[19].mxu0  ;;  %v758_v19 = vpop.f32.mrb[19].mxu1 }
 0x12d   : > { %1427 = vst [vmem:[%s1695_s9 + $0x58] sm:$0xff] %v1395_v7  }
 0x12e   : > { %v839_v20 = vadd.f32 %v1681_v44, %v800_v16  ;;  %v855_v21 = vadd.f32 %v1681_v44, %v816_v17  ;;  %v870_v22 = vmax.f32 %v838_v14, 0.0  ;;  %v886_v23 = vmax.f32 %v854_v15, 0.0 }
 0x130   : > { %v871_v24 = vmax.f32 %v839_v20, 0.0  ;;  %v887_v25 = vmax.f32 %v855_v21, 0.0 }
 0x131   : > { %v697_v26 = vpop.f32.mrb[20].mxu0  ;;  %v761_v27 = vpop.f32.mrb[20].mxu1 }
 0x132   : > { %v1360_v28 = vpack.c.bf16 %v871_v24, %v870_v22  ;;  %v1400_v29 = vpack.c.bf16 %v887_v25, %v886_v23  ;;  %v801_v30 = vmul.f32 %v1676_v42, %v697_v26  ;;  %v817_v31 = vmul.f32 %v1676_v42, %v761_v27  ;;  %v699_v32 = vpop.f32.mrb[21].mxu0  ;;  %v763_v33 = vpop.f32.mrb[21].mxu1 }
 0x133   : > { %v700_v34 = vpop.f32.mrb[22].mxu0  ;;  %v764_v35 = vpop.f32.mrb[22].mxu1 }
 0x134   : > { %1420 = vst [vmem:[%s1695_s9 + $0x20] sm:$0xff] %v1360_v28   ;;  %1428 = vst [vmem:[%s1695_s9 + $0x60] sm:$0xff] %v1400_v29   ;;  %v840_v36 = vadd.f32 %v1681_v44, %v801_v30  ;;  %v856_v37 = vadd.f32 %v1681_v44, %v817_v31  ;;  %v802_v38 = vmul.f32 %v1676_v42, %v700_v34  ;;  %v702_v40 = vpop.f32.mrb[23].mxu0  ;;  %v766_v41 = vpop.f32.mrb[23].mxu1 }
 0x135   : > { %v818_v39 = vmul.f32 %v1676_v42, %v764_v35 }
 0x136   : > { %v841_v43 = vadd.f32 %v1681_v44, %v802_v38  ;;  %v872_v46 = vmax.f32 %v840_v36, 0.0  ;;  %v888_v47 = vmax.f32 %v856_v37, 0.0 }
 0x137   : > { %v857_v45 = vadd.f32 %v1681_v44, %v818_v39 }
 0x138   : > { %v873_v48 = vmax.f32 %v841_v43, 0.0 }
 0x139   : > { %v889_v49 = vmax.f32 %v857_v45, 0.0  ;;  %v705_v50 = vpop.f32.mrb[24].mxu0  ;;  %v769_v51 = vpop.f32.mrb[24].mxu1 }
 0x13a   : > { %v1365_v52 = vpack.c.bf16 %v873_v48, %v872_v46  ;;  %v803_v54 = vmul.f32 %v1676_v42, %v705_v50  ;;  %v819_v55 = vmul.f32 %v1676_v42, %v769_v51  ;;  %v707_v56 = vpop.f32.mrb[25].mxu0  ;;  %v771_v57 = vpop.f32.mrb[25].mxu1 }
 0x13b   : > { %v1405_v53 = vpack.c.bf16 %v889_v49, %v888_v47  ;;  %v708_v58 = vpop.f32.mrb[26].mxu0  ;;  %v772_v59 = vpop.f32.mrb[26].mxu1 }
 0x13c   : > { %1421 = vst [vmem:[%s1695_s9 + $0x28] sm:$0xff] %v1365_v52   ;;  %v842_v60 = vadd.f32 %v1681_v44, %v803_v54  ;;  %v858_v61 = vadd.f32 %v1681_v44, %v819_v55  ;;  %v804_v62 = vmul.f32 %v1676_v42, %v708_v58  ;;  %v820_v63 = vmul.f32 %v1676_v42, %v772_v59  ;;  %v710_v0 = vpop.f32.mrb[27].mxu0  ;;  %v774_v1 = vpop.f32.mrb[27].mxu1 }
 0x13d   : > { %1429 = vst [vmem:[%s1695_s9 + $0x68] sm:$0xff] %v1405_v53  }
 0x13e   : > { %v843_v2 = vadd.f32 %v1681_v44, %v804_v62  ;;  %v859_v3 = vadd.f32 %v1681_v44, %v820_v63  ;;  %v874_v4 = vmax.f32 %v842_v60, 0.0  ;;  %v890_v5 = vmax.f32 %v858_v61, 0.0 }
 0x140   : > { %v875_v6 = vmax.f32 %v843_v2, 0.0  ;;  %v891_v7 = vmax.f32 %v859_v3, 0.0 }
 0x141   : > { %v713_v8 = vpop.f32.mrb[28].mxu0  ;;  %v777_v9 = vpop.f32.mrb[28].mxu1 }
 0x142   : > { %v1370_v10 = vpack.c.bf16 %v875_v6, %v874_v4  ;;  %v1410_v11 = vpack.c.bf16 %v891_v7, %v890_v5  ;;  %v805_v12 = vmul.f32 %v1676_v42, %v713_v8  ;;  %v821_v13 = vmul.f32 %v1676_v42, %v777_v9  ;;  %v715_v14 = vpop.f32.mrb[29].mxu0  ;;  %v779_v15 = vpop.f32.mrb[29].mxu1 }
 0x143   : > { %v716_v16 = vpop.f32.mrb[30].mxu0  ;;  %v780_v17 = vpop.f32.mrb[30].mxu1 }
 0x144   : > { %1422 = vst [vmem:[%s1695_s9 + $0x30] sm:$0xff] %v1370_v10   ;;  %1430 = vst [vmem:[%s1695_s9 + $0x70] sm:$0xff] %v1410_v11   ;;  %v844_v18 = vadd.f32 %v1681_v44, %v805_v12  ;;  %v860_v19 = vadd.f32 %v1681_v44, %v821_v13  ;;  %v806_v20 = vmul.f32 %v1676_v42, %v716_v16  ;;  %v718_v22 = vpop.f32.mrb[31].mxu0  ;;  %v782_v23 = vpop.f32.mrb[31].mxu1 }
 0x145   : > { %v822_v21 = vmul.f32 %v1676_v42, %v780_v17 }
 0x146   : > { %v845_v24 = vadd.f32 %v1681_v44, %v806_v20  ;;  %v876_v26 = vmax.f32 %v844_v18, 0.0  ;;  %v892_v27 = vmax.f32 %v860_v19, 0.0 }
 0x147   : > { %v861_v25 = vadd.f32 %v1681_v44, %v822_v21 }
 0x148   : > { %v877_v28 = vmax.f32 %v845_v24, 0.0 }
 0x149   : > { %v893_v29 = vmax.f32 %v861_v25, 0.0 }
 0x14a   : > { %v1375_v30 = vpack.c.bf16 %v877_v28, %v876_v26 }
 0x14b   : > { %v1415_v31 = vpack.c.bf16 %v893_v29, %v892_v27 }
 0x14c   : > { %1423 = vst [vmem:[%s1695_s9 + $0x38] sm:$0xff] %v1375_v30  }
 0x14d   : > { %1431 = vst [vmem:[%s1695_s9 + $0x78] sm:$0xff] %v1415_v31  }
 0x14e PF: > { %s14_s17 = sadd.s32 1, %s1555_s17   ;;  %s1783_s15 = smov %s1551_s16 }
 0x14f   : > { %p11_p5 = scmp.ge.s32.totalorder %s14_s17, 4   ;;  %s1784_s16 = smov %s1786_s18 }
 0x151   :  { %13 = sbr.rel (!%p11_p5) target bundleno = 2 (0x2), region = 75 }

// kernel: _lambda_.3
= control target key start
LH: loop header
LB: loop body
LE: loop exit
PB: predicated region body
PF: predicated region fallthrough
CT: control target
= control target key end

     0   :  { %s1330_s18 = smov 0   ;;  %s1332_s19 = smov 0   ;;  %s1555_s0 = inlined_call_operand.vmem [shape: bf16[2,256,36], index: 0, kind: input, shape index: {}]   ;;  %s1556_s1 = inlined_call_operand.vmem [shape: bf16[2,36,128], index: 1, kind: input, shape index: {}]   ;;  %s1557_s2 = inlined_call_operand.vmem [shape: f32[2,1,128], index: 2, kind: input, shape index: {}]   ;;  %s1558_s3 = inlined_call_operand.vmem [shape: f32[1,128], index: 3, kind: input, shape index: {}]   ;;  %s1559_s4 = inlined_call_operand.vmem [shape: f32[2,256,128], index: 4, kind: input, shape index: {}]   ;;  %s1560_s5 = inlined_call_operand.vmem [shape: f32[2,256,128], index: 5, kind: output, shape index: {}]  }
   0x1   :  { %s1334_s20 = smov 0  }
   0x2 LB: > { %s34_s21 = sadd.s32 1, %s1294_s19  ;;  %p1117_p0 = scmp.ge.s32.totalorder %s1298_s20, 1  ;;  %s1298_s20 = sphi %s1334_s20, %s15_s20   ;;  %s1294_s19 = sphi %s1332_s19, %s1562_s19   ;;  %s1290_s18 = sphi %s1330_s18, %s1561_s18  }
   0x3   : > { %p36_p1 = scmp.ge.s32.totalorder %s34_s21, 2  ;;  %p275_p2 = scmp.lt.s32.totalorder %s1298_s20, 3 }
   0x5   : > { %s1564_s21 = smov (%p36_p1, %s34_s21), 0  ;;  %p276_p3 = pnand %p1117_p0, %p275_p2 }
   0x6   : > { %p344_p4 = scmp.lt.s32.totalorder (!%p276_p3), %s1290_s18, 1  ;;  %vm529_vm0 = vcmask (!%p276_p3), 293888   ;;  %vm578_vm1 = vcmask (!%p276_p3), 1041408   ;;  %v1409_v22 = vld [vmem:[%s1558_s3] ss:$0 sm:$0xff] (!%p276_p3) }
   0x7   : > { %279 = sbr.rel (%p276_p3) target bundleno = 281 (0x119), region = 40 }
   0xe   : > { %s1566_s18 = smov (!%p344_p4, %s1290_s18), 1 }
   0xf   : > { %s1164_s22 = sshll.u32 %s1566_s18, 7  ;;  %s1232_s23 = smul.u32 20, %s1566_s18 }
  0x10   : > { %s1355_s26 = scalar_lea.vmem %s1555_s0, %s1164_s22  ;;  %s366_s7 = scalar_lea.vmem %s1557_s2, %s1566_s18 }
  0x11   : > { %s360_s29 = scalar_lea.vmem %s1556_s1, %s1232_s23  ;;  %v1260_v0 = vld [vmem:[%s1355_s26] sm:$0xff]   ;;  %v1262_v6 = vld [vmem:[%s1355_s26 + $0x8] sm:$0xff]   ;;  %v1264_v8 = vld [vmem:[%s1355_s26 + $0x10] sm:$0xff]   ;;  %s1165_s8 = sshll.u32 %s1566_s18, 8 }
  0x12   : > { %v1257_v1 = vld [vmem:[%s360_s29] sm:$0xff]   ;;  %v1258_v2 = vld [vmem:[%s360_s29 + $0x8] sm:$0xff]   ;;  %1192 = vmatprep.mubr.msk.bf16.mxu0 %vm529_vm0, %v1260_v0  ;;  %v1259_v3 = vld [vmem:[%s360_s29 + $0x10] ss:$0 sps:$4 sm:$0x33]   ;;  %s1404_s11 = scalar_lea.vmem %s1559_s4, %s1165_s8  ;;  %s1438_s16 = scalar_lea.vmem %s1560_s5, %s1165_s8 }
  0x13   : > { %1186 = vmatprep.subr.bf16.mxu0 %v1257_v1  ;;  %1224 = vmatprep.subr.bf16.mxu1 %v1257_v1  ;;  %v1261_v4 = vld [vmem:[%s1355_s26 + $0x40] sm:$0xff]   ;;  %v580_v5 = vsel %vm578_vm1, %v1259_v3, 0  ;;  %v1263_v7 = vld [vmem:[%s1355_s26 + $0x48] sm:$0xff]   ;;  %v1265_v9 = vld [vmem:[%s1355_s26 + $0x50] sm:$0xff]  }
  0x14   : > { %1187 = vmatpush3.bf16.msra.mxu0 %v1257_v1  ;;  %1227 = vmatpush3.bf16.msra.mxu1 %v1257_v1  ;;  %v1266_v10 = vld [vmem:[%s1355_s26 + $0x18] sm:$0xff]   ;;  %v1268_v12 = vld [vmem:[%s1355_s26 + $0x20] sm:$0xff]   ;;  %v1270_v14 = vld [vmem:[%s1355_s26 + $0x28] sm:$0xff]  }
  0x15   : > { %1188 = vmatprep.subr.bf16.mxu0 %v1258_v2  ;;  %1225 = vmatprep.subr.bf16.mxu1 %v1258_v2  ;;  %v1267_v11 = vld [vmem:[%s1355_s26 + $0x58] sm:$0xff]   ;;  %v1269_v13 = vld [vmem:[%s1355_s26 + $0x60] sm:$0xff]   ;;  %v1271_v15 = vld [vmem:[%s1355_s26 + $0x68] sm:$0xff]  }
  0x16   : > { %1208 = vmatprep.mubr.msk.bf16.mxu1 %vm529_vm0, %v1261_v4  ;;  %v1272_v16 = vld [vmem:[%s1355_s26 + $0x30] sm:$0xff]   ;;  %v1274_v18 = vld [vmem:[%s1355_s26 + $0x38] sm:$0xff]   ;;  %v1397_v20 = vld [vmem:[%s366_s7] ss:$0 sm:$0xff] }
  0x17   : > { %v1273_v17 = vld [vmem:[%s1355_s26 + $0x70] sm:$0xff]   ;;  %v1275_v19 = vld [vmem:[%s1355_s26 + $0x78] sm:$0xff]   ;;  %v821_v36 = vld [vmem:[%s1404_s11] sm:$0xff] }
  0x18   : > { %1189 = vmatpush3.bf16.msra.mxu0 %v1258_v2  ;;  %1228 = vmatpush3.bf16.msra.mxu1 %v1258_v2  ;;  %v823_v28 = vld [vmem:[%s1404_s11 + $0x10] sm:$0xff]  ;;  %v837_v37 = vld [vmem:[%s1404_s11 + $0x80] sm:$0xff]  ;;  %v824_v44 = vld [vmem:[%s1404_s11 + $0x18] sm:$0xff] }
  0x19   : > { %1230 = vmatprep.subr.msk.bf16.mxu0 %vm578_vm1, %v1259_v3  ;;  %1231 = vmatprep.subr.msk.bf16.mxu1 %vm578_vm1, %v1259_v3  ;;  %v839_v29 = vld [vmem:[%s1404_s11 + $0x90] sm:$0xff]  ;;  %v840_v45 = vld [vmem:[%s1404_s11 + $0x98] sm:$0xff]  ;;  %v822_v52 = vld [vmem:[%s1404_s11 + $0x8] sm:$0xff] }
  0x1a   : > { %v838_v53 = vld [vmem:[%s1404_s11 + $0x88] sm:$0xff] }
  0x1c   : > { %1191 = vmatpush3.bf16.msra.mxu0 %v580_v5  ;;  %1229 = vmatpush3.bf16.msra.mxu1 %v580_v5 }
  0x1f   : > { %1193 = vmatmul.mubr.msk.bf16.vlgmr.msra.gmra.mrb[0].mxu0 %vm529_vm0, %v1262_v6  ;;  %1209 = vmatmul.mubr.msk.bf16.vlgmr.msra.gmra.mrb[0].mxu1 %vm529_vm0, %v1263_v7 }
  0x20   : > { %1196 = vmatprep.mubr.msk.bf16.mxu0 %vm529_vm0, %v1264_v8  ;;  %1212 = vmatprep.mubr.msk.bf16.mxu1 %vm529_vm0, %v1265_v9 }
  0x27   : > { %1197 = vmatmul.mubr.msk.bf16.gmra.mrb[4].mxu0 %vm529_vm0, %v1266_v10  ;;  %1213 = vmatmul.mubr.msk.bf16.gmra.mrb[4].mxu1 %vm529_vm0, %v1267_v11 }
  0x28   : > { %1200 = vmatprep.mubr.msk.bf16.mxu0 %vm529_vm0, %v1268_v12  ;;  %1216 = vmatprep.mubr.msk.bf16.mxu1 %vm529_vm0, %v1269_v13  ;;  %v827_v12 = vld [vmem:[%s1404_s11 + $0x30] sm:$0xff] }
  0x29   : > { %v843_v13 = vld [vmem:[%s1404_s11 + $0xb0] sm:$0xff] }
  0x2f   : > { %1201 = vmatmul.mubr.msk.bf16.gmra.mrb[8].mxu0 %vm529_vm0, %v1270_v14  ;;  %1217 = vmatmul.mubr.msk.bf16.gmra.mrb[8].mxu1 %vm529_vm0, %v1271_v15 }
  0x30   : > { %1204 = vmatprep.mubr.msk.bf16.mxu0 %vm529_vm0, %v1272_v16  ;;  %1220 = vmatprep.mubr.msk.bf16.mxu1 %vm529_vm0, %v1273_v17 }
  0x37   : > { %1205 = vmatmul.mubr.msk.bf16.gmra.mrb[12].mxu0 %vm529_vm0, %v1274_v18  ;;  %1221 = vmatmul.mubr.msk.bf16.gmra.mrb[12].mxu1 %vm529_vm0, %v1275_v19 }
  0xf2   : > { %v1194_v21 = vpop.f32.mrb[0].mxu0  ;;  %v1210_v23 = vpop.f32.mrb[0].mxu1 }
  0xf3   : > { %v752_v24 = vmul.f32 %v1194_v21, %v1397_v20  ;;  %v768_v25 = vmul.f32 %v1210_v23, %v1397_v20  ;;  %v616_v26 = vpop.f32.mrb[1].mxu0  ;;  %v680_v27 = vpop.f32.mrb[1].mxu1  ;;  %v825_v21 = vld [vmem:[%s1404_s11 + $0x20] sm:$0xff] }
  0xf4   : > { %v750_v30 = vmul.f32 %v1397_v20, %v616_v26  ;;  %v766_v31 = vmul.f32 %v1397_v20, %v680_v27  ;;  %v1195_v32 = vpop.f32.mrb[2].mxu0  ;;  %v1211_v33 = vpop.f32.mrb[2].mxu1  ;;  %v841_v23 = vld [vmem:[%s1404_s11 + $0xa0] sm:$0xff] }
  0xf5   : > { %v791_v34 = vadd.f32 %v1409_v22, %v752_v24  ;;  %v807_v35 = vadd.f32 %v1409_v22, %v768_v25  ;;  %v753_v38 = vmul.f32 %v1195_v32, %v1397_v20  ;;  %v769_v39 = vmul.f32 %v1211_v33, %v1397_v20  ;;  %v619_v40 = vpop.f32.mrb[3].mxu0  ;;  %v683_v41 = vpop.f32.mrb[3].mxu1 }
  0xf6   : > { %v789_v42 = vadd.f32 %v1409_v22, %v750_v30  ;;  %v805_v43 = vadd.f32 %v1409_v22, %v766_v31  ;;  %v751_v46 = vmul.f32 %v1397_v20, %v619_v40  ;;  %v767_v47 = vmul.f32 %v1397_v20, %v683_v41  ;;  %v828_v30 = vld [vmem:[%s1404_s11 + $0x38] sm:$0xff] }
  0xf7   : > { %v855_v48 = vadd.f32 %v823_v28, %v791_v34  ;;  %v871_v49 = vadd.f32 %v839_v29, %v807_v35  ;;  %v792_v50 = vadd.f32 %v1409_v22, %v753_v38  ;;  %v808_v51 = vadd.f32 %v1409_v22, %v769_v39  ;;  %v844_v31 = vld [vmem:[%s1404_s11 + $0xb8] sm:$0xff]  ;;  %v826_v38 = vld [vmem:[%s1404_s11 + $0x28] sm:$0xff] }
  0xf8   : > { %v853_v54 = vadd.f32 %v821_v36, %v789_v42  ;;  %v869_v55 = vadd.f32 %v837_v37, %v805_v43  ;;  %v790_v56 = vadd.f32 %v1409_v22, %v751_v46  ;;  %v806_v57 = vadd.f32 %v1409_v22, %v767_v47  ;;  %v842_v39 = vld [vmem:[%s1404_s11 + $0xa8] sm:$0xff] }
  0xf9   : > { %v887_v58 = vmax.f32 %v855_v48, 0.0  ;;  %v903_v59 = vmax.f32 %v871_v49, 0.0  ;;  %v856_v60 = vadd.f32 %v824_v44, %v792_v50  ;;  %v872_v61 = vadd.f32 %v840_v45, %v808_v51 }
  0xfa   : > { %v885_v62 = vmax.f32 %v853_v54, 0.0  ;;  %v901_v63 = vmax.f32 %v869_v55, 0.0  ;;  %v854_v0 = vadd.f32 %v822_v52, %v790_v56  ;;  %v870_v1 = vadd.f32 %v838_v53, %v806_v57  ;;  %v1198_v2 = vpop.f32.mrb[4].mxu0  ;;  %v1214_v3 = vpop.f32.mrb[4].mxu1 }
  0xfb   : > { %919 = vst [vmem:[%s1438_s16 + $0x10] sm:$0xff] %v887_v58  ;;  %935 = vst [vmem:[%s1438_s16 + $0x90] sm:$0xff] %v903_v59  ;;  %v888_v4 = vmax.f32 %v856_v60, 0.0  ;;  %v904_v5 = vmax.f32 %v872_v61, 0.0  ;;  %v756_v6 = vmul.f32 %v1198_v2, %v1397_v20  ;;  %v772_v7 = vmul.f32 %v1214_v3, %v1397_v20  ;;  %v632_v8 = vpop.f32.mrb[5].mxu0  ;;  %v696_v9 = vpop.f32.mrb[5].mxu1 }
  0xfc   : > { %917 = vst [vmem:[%s1438_s16] sm:$0xff] %v885_v62  ;;  %933 = vst [vmem:[%s1438_s16 + $0x80] sm:$0xff] %v901_v63  ;;  %v886_v10 = vmax.f32 %v854_v0, 0.0  ;;  %v902_v11 = vmax.f32 %v870_v1, 0.0  ;;  %v754_v14 = vmul.f32 %v1397_v20, %v632_v8  ;;  %v770_v15 = vmul.f32 %v1397_v20, %v696_v9  ;;  %v1199_v16 = vpop.f32.mrb[6].mxu0  ;;  %v1215_v17 = vpop.f32.mrb[6].mxu1  ;;  %v831_v62 = vld [vmem:[%s1404_s11 + $0x50] sm:$0xff] }
  0xfd   : > { %920 = vst [vmem:[%s1438_s16 + $0x18] sm:$0xff] %v888_v4  ;;  %936 = vst [vmem:[%s1438_s16 + $0x98] sm:$0xff] %v904_v5  ;;  %v795_v18 = vadd.f32 %v1409_v22, %v756_v6  ;;  %v811_v19 = vadd.f32 %v1409_v22, %v772_v7  ;;  %v757_v24 = vmul.f32 %v1199_v16, %v1397_v20  ;;  %v635_v26 = vpop.f32.mrb[7].mxu0  ;;  %v699_v27 = vpop.f32.mrb[7].mxu1  ;;  %v847_v63 = vld [vmem:[%s1404_s11 + $0xd0] sm:$0xff]  ;;  %v829_v6 = vld [vmem:[%s1404_s11 + $0x40] sm:$0xff] }
  0xfe   : > { %v773_v25 = vmul.f32 %v1215_v17, %v1397_v20  ;;  %918 = vst [vmem:[%s1438_s16 + $0x8] sm:$0xff] %v886_v10  ;;  %934 = vst [vmem:[%s1438_s16 + $0x88] sm:$0xff] %v902_v11  ;;  %v793_v28 = vadd.f32 %v1409_v22, %v754_v14  ;;  %v809_v29 = vadd.f32 %v1409_v22, %v770_v15  ;;  %v845_v7 = vld [vmem:[%s1404_s11 + $0xc0] sm:$0xff]  ;;  %v832_v14 = vld [vmem:[%s1404_s11 + $0x58] sm:$0xff] }
  0xff   : > { %v755_v32 = vmul.f32 %v1397_v20, %v635_v26  ;;  %v771_v33 = vmul.f32 %v1397_v20, %v699_v27  ;;  %v859_v34 = vadd.f32 %v827_v12, %v795_v18  ;;  %v875_v35 = vadd.f32 %v843_v13, %v811_v19  ;;  %v848_v15 = vld [vmem:[%s1404_s11 + $0xd8] sm:$0xff] }
 0x100   : > { %v796_v36 = vadd.f32 %v1409_v22, %v757_v24  ;;  %v812_v37 = vadd.f32 %v1409_v22, %v773_v25  ;;  %v857_v40 = vadd.f32 %v825_v21, %v793_v28  ;;  %v873_v41 = vadd.f32 %v841_v23, %v809_v29  ;;  %v830_v24 = vld [vmem:[%s1404_s11 + $0x48] sm:$0xff] }
 0x101   : > { %v794_v42 = vadd.f32 %v1409_v22, %v755_v32  ;;  %v810_v43 = vadd.f32 %v1409_v22, %v771_v33  ;;  %v891_v44 = vmax.f32 %v859_v34, 0.0  ;;  %v907_v45 = vmax.f32 %v875_v35, 0.0  ;;  %v846_v25 = vld [vmem:[%s1404_s11 + $0xc8] sm:$0xff] }
 0x102   : > { %v860_v46 = vadd.f32 %v828_v30, %v796_v36  ;;  %v876_v47 = vadd.f32 %v844_v31, %v812_v37  ;;  %v889_v48 = vmax.f32 %v857_v40, 0.0  ;;  %v905_v49 = vmax.f32 %v873_v41, 0.0  ;;  %v1202_v52 = vpop.f32.mrb[8].mxu0  ;;  %v1218_v53 = vpop.f32.mrb[8].mxu1 }
 0x103   : > { %v858_v50 = vadd.f32 %v826_v38, %v794_v42  ;;  %v874_v51 = vadd.f32 %v842_v39, %v810_v43  ;;  %923 = vst [vmem:[%s1438_s16 + $0x30] sm:$0xff] %v891_v44  ;;  %939 = vst [vmem:[%s1438_s16 + $0xb0] sm:$0xff] %v907_v45  ;;  %v760_v56 = vmul.f32 %v1202_v52, %v1397_v20  ;;  %v648_v58 = vpop.f32.mrb[9].mxu0  ;;  %v712_v59 = vpop.f32.mrb[9].mxu1 }
 0x104   : > { %v892_v54 = vmax.f32 %v860_v46, 0.0  ;;  %v908_v55 = vmax.f32 %v876_v47, 0.0  ;;  %v776_v57 = vmul.f32 %v1218_v53, %v1397_v20  ;;  %921 = vst [vmem:[%s1438_s16 + $0x20] sm:$0xff] %v889_v48  ;;  %937 = vst [vmem:[%s1438_s16 + $0xa0] sm:$0xff] %v905_v49  ;;  %v758_v0 = vmul.f32 %v1397_v20, %v648_v58  ;;  %v1203_v2 = vpop.f32.mrb[10].mxu0  ;;  %v1219_v3 = vpop.f32.mrb[10].mxu1 }
 0x105   : > { %v890_v60 = vmax.f32 %v858_v50, 0.0  ;;  %v906_v61 = vmax.f32 %v874_v51, 0.0  ;;  %v774_v1 = vmul.f32 %v1397_v20, %v712_v59  ;;  %v799_v4 = vadd.f32 %v1409_v22, %v760_v56  ;;  %v651_v10 = vpop.f32.mrb[11].mxu0  ;;  %v715_v11 = vpop.f32.mrb[11].mxu1  ;;  %v835_v48 = vld [vmem:[%s1404_s11 + $0x70] sm:$0xff]  ;;  %v833_v56 = vld [vmem:[%s1404_s11 + $0x60] sm:$0xff] }
 0x106   : > { %924 = vst [vmem:[%s1438_s16 + $0x38] sm:$0xff] %v892_v54  ;;  %940 = vst [vmem:[%s1438_s16 + $0xb8] sm:$0xff] %v908_v55  ;;  %v815_v5 = vadd.f32 %v1409_v22, %v776_v57  ;;  %v761_v8 = vmul.f32 %v1203_v2, %v1397_v20  ;;  %v777_v9 = vmul.f32 %v1219_v3, %v1397_v20  ;;  %v851_v49 = vld [vmem:[%s1404_s11 + $0xf0] sm:$0xff]  ;;  %v849_v57 = vld [vmem:[%s1404_s11 + $0xe0] sm:$0xff] }
 0x107   : > { %922 = vst [vmem:[%s1438_s16 + $0x28] sm:$0xff] %v890_v60  ;;  %938 = vst [vmem:[%s1438_s16 + $0xa8] sm:$0xff] %v906_v61  ;;  %v797_v12 = vadd.f32 %v1409_v22, %v758_v0  ;;  %v813_v13 = vadd.f32 %v1409_v22, %v774_v1  ;;  %v759_v16 = vmul.f32 %v1397_v20, %v651_v10  ;;  %v836_v0 = vld [vmem:[%s1404_s11 + $0x78] sm:$0xff] }
 0x108   : > { %v775_v17 = vmul.f32 %v1397_v20, %v715_v11  ;;  %v863_v18 = vadd.f32 %v831_v62, %v799_v4  ;;  %v879_v19 = vadd.f32 %v847_v63, %v815_v5  ;;  %v800_v21 = vadd.f32 %v1409_v22, %v761_v8  ;;  %v852_v1 = vld [vmem:[%s1404_s11 + $0xf8] sm:$0xff]  ;;  %v834_v8 = vld [vmem:[%s1404_s11 + $0x68] sm:$0xff] }
 0x109   : > { %v816_v23 = vadd.f32 %v1409_v22, %v777_v9  ;;  %v861_v26 = vadd.f32 %v829_v6, %v797_v12  ;;  %v877_v27 = vadd.f32 %v845_v7, %v813_v13  ;;  %v798_v28 = vadd.f32 %v1409_v22, %v759_v16  ;;  %v850_v9 = vld [vmem:[%s1404_s11 + $0xe8] sm:$0xff] }
 0x10a   : > { %v814_v29 = vadd.f32 %v1409_v22, %v775_v17  ;;  %v895_v30 = vmax.f32 %v863_v18, 0.0  ;;  %v911_v31 = vmax.f32 %v879_v19, 0.0  ;;  %v864_v32 = vadd.f32 %v832_v14, %v800_v21  ;;  %v1206_v38 = vpop.f32.mrb[12].mxu0  ;;  %v1222_v39 = vpop.f32.mrb[12].mxu1 }
 0x10b   : > { %v880_v33 = vadd.f32 %v848_v15, %v816_v23  ;;  %v893_v34 = vmax.f32 %v861_v26, 0.0  ;;  %v909_v35 = vmax.f32 %v877_v27, 0.0  ;;  %v862_v36 = vadd.f32 %v830_v24, %v798_v28  ;;  %v664_v44 = vpop.f32.mrb[13].mxu0  ;;  %v728_v45 = vpop.f32.mrb[13].mxu1 }
 0x10c   : > { %v878_v37 = vadd.f32 %v846_v25, %v814_v29  ;;  %927 = vst [vmem:[%s1438_s16 + $0x50] sm:$0xff] %v895_v30  ;;  %943 = vst [vmem:[%s1438_s16 + $0xd0] sm:$0xff] %v911_v31  ;;  %v896_v40 = vmax.f32 %v864_v32, 0.0  ;;  %v764_v42 = vmul.f32 %v1206_v38, %v1397_v20  ;;  %v780_v43 = vmul.f32 %v1222_v39, %v1397_v20  ;;  %v1207_v52 = vpop.f32.mrb[14].mxu0  ;;  %v1223_v53 = vpop.f32.mrb[14].mxu1 }
 0x10d   : > { %v912_v41 = vmax.f32 %v880_v33, 0.0  ;;  %925 = vst [vmem:[%s1438_s16 + $0x40] sm:$0xff] %v893_v34  ;;  %941 = vst [vmem:[%s1438_s16 + $0xc0] sm:$0xff] %v909_v35  ;;  %v894_v46 = vmax.f32 %v862_v36, 0.0  ;;  %v762_v50 = vmul.f32 %v1397_v20, %v664_v44  ;;  %v778_v51 = vmul.f32 %v1397_v20, %v728_v45  ;;  %v667_v60 = vpop.f32.mrb[15].mxu0  ;;  %v731_v61 = vpop.f32.mrb[15].mxu1 }
 0x10e   : > { %v910_v47 = vmax.f32 %v878_v37, 0.0  ;;  %928 = vst [vmem:[%s1438_s16 + $0x58] sm:$0xff] %v896_v40  ;;  %v803_v54 = vadd.f32 %v1409_v22, %v764_v42  ;;  %v819_v55 = vadd.f32 %v1409_v22, %v780_v43  ;;  %v765_v58 = vmul.f32 %v1207_v52, %v1397_v20 }
 0x10f   : > { %944 = vst [vmem:[%s1438_s16 + $0xd8] sm:$0xff] %v912_v41  ;;  %v781_v59 = vmul.f32 %v1223_v53, %v1397_v20  ;;  %926 = vst [vmem:[%s1438_s16 + $0x48] sm:$0xff] %v894_v46  ;;  %v801_v62 = vadd.f32 %v1409_v22, %v762_v50  ;;  %v817_v63 = vadd.f32 %v1409_v22, %v778_v51 }
 0x110   : > { %942 = vst [vmem:[%s1438_s16 + $0xc8] sm:$0xff] %v910_v47  ;;  %v763_v2 = vmul.f32 %v1397_v20, %v667_v60  ;;  %v779_v3 = vmul.f32 %v1397_v20, %v731_v61  ;;  %v867_v4 = vadd.f32 %v835_v48, %v803_v54  ;;  %v883_v5 = vadd.f32 %v851_v49, %v819_v55 }
 0x111   : > { %v804_v6 = vadd.f32 %v1409_v22, %v765_v58  ;;  %v820_v7 = vadd.f32 %v1409_v22, %v781_v59  ;;  %v865_v10 = vadd.f32 %v833_v56, %v801_v62  ;;  %v881_v11 = vadd.f32 %v849_v57, %v817_v63 }
 0x112   : > { %v802_v12 = vadd.f32 %v1409_v22, %v763_v2  ;;  %v818_v13 = vadd.f32 %v1409_v22, %v779_v3  ;;  %v899_v14 = vmax.f32 %v867_v4, 0.0  ;;  %v915_v20 = vmax.f32 %v883_v5, 0.0 }
 0x113   : > { %v868_v15 = vadd.f32 %v836_v0, %v804_v6  ;;  %v884_v16 = vadd.f32 %v852_v1, %v820_v7  ;;  %v897_v17 = vmax.f32 %v865_v10, 0.0  ;;  %v913_v18 = vmax.f32 %v881_v11, 0.0 }
 0x114   : > { %v866_v19 = vadd.f32 %v834_v8, %v802_v12  ;;  %v882_v21 = vadd.f32 %v850_v9, %v818_v13  ;;  %931 = vst [vmem:[%s1438_s16 + $0x70] sm:$0xff] %v899_v14  ;;  %947 = vst [vmem:[%s1438_s16 + $0xf0] sm:$0xff] %v915_v20 }
 0x115   : > { %v900_v23 = vmax.f32 %v868_v15, 0.0  ;;  %v916_v24 = vmax.f32 %v884_v16, 0.0  ;;  %929 = vst [vmem:[%s1438_s16 + $0x60] sm:$0xff] %v897_v17  ;;  %945 = vst [vmem:[%s1438_s16 + $0xe0] sm:$0xff] %v913_v18 }
 0x116   : > { %v898_v25 = vmax.f32 %v866_v19, 0.0  ;;  %v914_v22 = vmax.f32 %v882_v21, 0.0 }
 0x117   : > { %932 = vst [vmem:[%s1438_s16 + $0x78] sm:$0xff] %v900_v23  ;;  %948 = vst [vmem:[%s1438_s16 + $0xf8] sm:$0xff] %v916_v24 }
 0x118   : > { %930 = vst [vmem:[%s1438_s16 + $0x68] sm:$0xff] %v898_v25  ;;  %946 = vst [vmem:[%s1438_s16 + $0xe8] sm:$0xff] %v914_v22 }
 0x119 PF: > { %s15_s20 = sadd.s32 1, %s1298_s20   ;;  %s1561_s18 = smov %s1294_s19 }
 0x11a   : > { %p12_p5 = scmp.ge.s32.totalorder %s15_s20, 4   ;;  %s1562_s19 = smov %s1564_s21 }
 0x11c   :  { %14 = sbr.rel (!%p12_p5) target bundleno = 2 (0x2), region = 82 }

</bundles_post_ra>
